<compile_context>
chip_gen: v6e
topology: v6e:2x2x1
jax: 0.10.0
libtpu: 0.0.40
codegen_flags: <defaults>
</compile_context>

<pallas_src>
import functools

import jax
import jax.numpy as jnp
from jax.experimental import pallas as pl
from jax.experimental.pallas import tpu as pltpu

_LANES = 128
_ACC_ROWS = 32          # accumulator = 4 f32 vregs -> 4-way ILP on the VALU adds
_MAX_TILE_ROWS = 4096   # (4096, 128) f32 tile = 2 MiB per input buffer


def _round_up(x, m):
    return -(-x // m) * m


def _split_lane_slab(x):
    """Split a tensor into a lane-dense (rows, 128) prefix slab + <128-elem tail.

    When numel % 128 == 0 this is a free reshape (no copy); otherwise only the
    tiny tail (<512 bytes) is handled scalar-side — no full-array jnp.pad."""
    n = x.size
    v = jnp.ravel(x)
    rows = n // _LANES
    main = v[: rows * _LANES].reshape(rows, _LANES) if rows > 0 else None
    tail = v[rows * _LANES:]
    return main, tail, rows


def _tile_geometry(rows):
    tile_rows = min(_MAX_TILE_ROWS, _round_up(rows, _ACC_ROWS))
    n_tiles = -(-rows // tile_rows)
    return tile_rows, n_tiles


def _fused_loss_kernel(noised_ref, orig_ref, pattn_ref, sse_ref, latt_ref, *,
                       img_tile_rows, n_img_tiles, img_rows,
                       pattn_tile_rows, n_pattn_tiles, pattn_rows,
                       grid_size):
    i = pl.program_id(0)

    @pl.when(i == 0)
    def _():
        sse_ref[...] = jnp.zeros_like(sse_ref)
        latt_ref[...] = jnp.zeros_like(latt_ref)

    # ---------- squared-error stream (noised vs original) ----------
    def sse_accum(masked):
        d = noised_ref[...].astype(jnp.float32) - orig_ref[...].astype(jnp.float32)
        sq = d * d
        if masked:
            row0 = (n_img_tiles - 1) * img_tile_rows
            row_ids = (jax.lax.broadcasted_iota(
                jnp.int32, (img_tile_rows, _LANES), 0) + row0)
            # select (NOT multiply): rows past the slab end hold garbage that
            # may decode as NaN/Inf; jnp.where drops them cleanly.
            sq = jnp.where(row_ids < img_rows, sq, 0.0)
        sse_ref[...] += sq.reshape(img_tile_rows // _ACC_ROWS, _ACC_ROWS,
                                   _LANES).sum(axis=0)

    img_tail = img_rows % img_tile_rows        # static Python int
    if img_tail == 0:
        if grid_size == n_img_tiles:
            sse_accum(False)                   # hot path: no mask, no predicate
        else:
            pl.when(i < n_img_tiles)(lambda: sse_accum(False))
    else:
        if n_img_tiles > 1:
            pl.when(i < n_img_tiles - 1)(lambda: sse_accum(False))
        pl.when(i == n_img_tiles - 1)(lambda: sse_accum(True))

    # ---------- pattn sum stream ----------
    def latt_accum(masked):
        x = pattn_ref[...].astype(jnp.float32)
        if masked:
            row0 = (n_pattn_tiles - 1) * pattn_tile_rows
            row_ids = (jax.lax.broadcasted_iota(
                jnp.int32, (pattn_tile_rows, _LANES), 0) + row0)
            x = jnp.where(row_ids < pattn_rows, x, 0.0)
        latt_ref[...] += x.reshape(pattn_tile_rows // _ACC_ROWS, _ACC_ROWS,
                                   _LANES).sum(axis=0)

    pattn_tail = pattn_rows % pattn_tile_rows  # static Python int
    if pattn_tail == 0:
        if grid_size == n_pattn_tiles:
            latt_accum(False)
        else:
            pl.when(i < n_pattn_tiles)(lambda: latt_accum(False))
    else:
        if n_pattn_tiles > 1:
            pl.when(i < n_pattn_tiles - 1)(lambda: latt_accum(False))
        pl.when(i == n_pattn_tiles - 1)(lambda: latt_accum(True))


def _run_fused(noised_2d, orig_2d, img_rows, pattn_2d, pattn_rows):
    img_tile_rows, n_img_tiles = _tile_geometry(img_rows)
    pattn_tile_rows, n_pattn_tiles = _tile_geometry(pattn_rows)
    grid_size = max(n_img_tiles, n_pattn_tiles)

    img_last = n_img_tiles - 1
    pattn_last = n_pattn_tiles - 1

    # Clamped index_maps: once the shorter stream is exhausted its block index
    # stops changing, so Pallas issues no further DMA for it.
    if n_img_tiles == grid_size:
        img_map = lambda i: (i, 0)
    else:
        img_map = lambda i: (jnp.minimum(i, img_last), 0)
    if n_pattn_tiles == grid_size:
        pattn_map = lambda i: (i, 0)
    else:
        pattn_map = lambda i: (jnp.minimum(i, pattn_last), 0)

    kernel = functools.partial(
        _fused_loss_kernel,
        img_tile_rows=img_tile_rows, n_img_tiles=n_img_tiles, img_rows=img_rows,
        pattn_tile_rows=pattn_tile_rows, n_pattn_tiles=n_pattn_tiles,
        pattn_rows=pattn_rows, grid_size=grid_size)

    bytes_in = (noised_2d.size * noised_2d.dtype.itemsize
                + orig_2d.size * orig_2d.dtype.itemsize
                + pattn_2d.size * pattn_2d.dtype.itemsize)
    cost = pl.CostEstimate(
        flops=3 * img_rows * _LANES + pattn_rows * _LANES,
        transcendentals=0,
        bytes_accessed=bytes_in + 2 * _ACC_ROWS * _LANES * 4)

    sse_p, latt_p = pl.pallas_call(
        kernel,
        out_shape=(jax.ShapeDtypeStruct((_ACC_ROWS, _LANES), jnp.float32),
                   jax.ShapeDtypeStruct((_ACC_ROWS, _LANES), jnp.float32)),
        grid_spec=pltpu.PrefetchScalarGridSpec(
            num_scalar_prefetch=0,
            grid=(grid_size,),
            in_specs=[pl.BlockSpec((img_tile_rows, _LANES), img_map),
                      pl.BlockSpec((img_tile_rows, _LANES), img_map),
                      pl.BlockSpec((pattn_tile_rows, _LANES), pattn_map)],
            out_specs=[pl.BlockSpec((_ACC_ROWS, _LANES), lambda i: (0, 0)),
                       pl.BlockSpec((_ACC_ROWS, _LANES), lambda i: (0, 0))]),
        compiler_params=pltpu.CompilerParams(
            dimension_semantics=("arbitrary",),
            vmem_limit_bytes=32 * 1024 * 1024),
        cost_estimate=cost,
    )(noised_2d, orig_2d, pattn_2d)
    return sse_p, latt_p


@jax.jit
def generator_loss(pattn, noised, original_image, model_loss,
                   beta=5e-05, gamma=0.005, sigma=1.0):
    assert noised.shape == original_image.shape
    n_img = noised.size

    pattn_2d, pattn_tail, pattn_rows = _split_lane_slab(pattn)
    noised_2d, noised_tail, img_rows = _split_lane_slab(noised)
    orig_2d, orig_tail, _ = _split_lane_slab(original_image)

    # Degenerate (<128-element) streams are fully handled by the scalar-side
    # tail path; give the kernel a tiny zero slab so its structure stays fixed.
    if img_rows == 0:
        noised_2d = jnp.zeros((_ACC_ROWS, _LANES), jnp.float32)
        orig_2d = jnp.zeros((_ACC_ROWS, _LANES), jnp.float32)
        img_rows_k = _ACC_ROWS
    else:
        img_rows_k = img_rows
    if pattn_rows == 0:
        pattn_2d = jnp.zeros((_ACC_ROWS, _LANES), jnp.float32)
        pattn_rows_k = _ACC_ROWS
    else:
        pattn_rows_k = pattn_rows

    sse_p, latt_p = _run_fused(noised_2d, orig_2d, img_rows_k,
                               pattn_2d, pattn_rows_k)

    # Tiny scalar epilogue: fold partials, add <128-element tails, combine.
    latt = jnp.sum(latt_p)
    sse = jnp.sum(sse_p)
    if pattn_tail.size:
        latt = latt + jnp.sum(pattn_tail.astype(jnp.float32))
    if noised_tail.size:
        dt = noised_tail.astype(jnp.float32) - orig_tail.astype(jnp.float32)
        sse = sse + jnp.sum(dt * dt)

    lrec = sse * (1.0 / float(n_img))
    ml = jnp.asarray(model_loss, jnp.float32)
    return beta * latt - gamma * ml + sigma * lrec


def _reference(pattn, noised, original, model_loss,
               beta=5e-05, gamma=0.005, sigma=1.0):
    latt = jnp.sum(pattn)
    lrec = jnp.mean((noised - original) ** 2)
    return beta * latt - gamma * model_loss + sigma * lrec


if __name__ == "__main__":
    key = jax.random.PRNGKey(0)
    k1, k2, k3, k4, k5 = jax.random.split(key, 5)

    # small NCHW-like shapes (numel a multiple of 128 -> free reshape path)
    pattn = jax.random.uniform(k1, (2, 4, 16, 16), dtype=jnp.float32)
    noised = jax.random.normal(k2, (2, 4, 16, 16), dtype=jnp.float32)
    original = jax.random.normal(k3, (2, 4, 16, 16), dtype=jnp.float32)
    model_loss = jax.random.uniform(k4, (), dtype=jnp.float32)

    lg = jax.block_until_ready(generator_loss(pattn, noised, original, model_loss))
    lg_ref = _reference(pattn, noised, original, model_loss)
    assert jnp.allclose(lg, lg_ref, rtol=1e-5, atol=1e-5), (lg, lg_ref)

    # second check: pattn numel NOT a multiple of 128 (ragged lane tail + row mask)
    pattn2 = jax.random.uniform(k5, (2, 4, 65, 65), dtype=jnp.float32)
    lg2 = jax.block_until_ready(generator_loss(pattn2, noised, original, model_loss))
    lg2_ref = _reference(pattn2, noised, original, model_loss)
    assert jnp.allclose(lg2, lg2_ref, rtol=1e-5, atol=1e-5), (lg2, lg2_ref)

    print("KERNEL_OK")
</pallas_src>

<mosaic_0001>
module attributes {stable_mosaic.version = 11 : i64} {
  func.func @_fused_loss_kernel(%arg0: i32, %arg1: memref<32x128xf32, #tpu.memory_space<vmem>>, %arg2: memref<32x128xf32, #tpu.memory_space<vmem>>, %arg3: memref<32x128xf32, #tpu.memory_space<vmem>>, %arg4: memref<32x128xf32, #tpu.memory_space<vmem>>, %arg5: memref<32x128xf32, #tpu.memory_space<vmem>>) attributes {dimension_semantics = [#tpu.dimension_semantics<arbitrary>], iteration_bounds = array<i64: 1>, scalar_prefetch = 0 : i64, scratch_operands = 0 : i64, tpu.core_type = #tpu.core_type<tc>, window_params = [{transform_indices = @transform_0, window_bounds = array<i64: 32, 128>}, {transform_indices = @transform_1, window_bounds = array<i64: 32, 128>}, {transform_indices = @transform_2, window_bounds = array<i64: 32, 128>}, {pipeline_mode = #tpu.pipeline_mode<synchronous>, transform_indices = @transform_3, window_bounds = array<i64: 32, 128>}, {pipeline_mode = #tpu.pipeline_mode<synchronous>, transform_indices = @transform_4, window_bounds = array<i64: 32, 128>}]} {
    %c0_i32 = arith.constant 0 : i32
    %0 = arith.cmpi eq, %arg0, %c0_i32 : i32
    %1 = arith.extui %0 : i1 to i32
    %c0_i32_0 = arith.constant 0 : i32
    %2 = arith.cmpi ne, %1, %c0_i32_0 : i32
    scf.if %2 {
      %cst = arith.constant 0.000000e+00 : f32
      %9 = vector.broadcast %cst : f32 to vector<32x128xf32>
      %c0 = arith.constant 0 : index
      %c0_5 = arith.constant 0 : index
      %10 = vector.load %arg4[%c0, %c0_5] : memref<32x128xf32, #tpu.memory_space<vmem>>, vector<32x128xf32>
      tpu.vector_store %arg4[%c0, %c0_5], %9 {strides = array<i32>} : memref<32x128xf32, #tpu.memory_space<vmem>>, vector<32x128xf32>,
      %cst_6 = arith.constant 0.000000e+00 : f32
      %11 = vector.broadcast %cst_6 : f32 to vector<32x128xf32>
      %c0_7 = arith.constant 0 : index
      %c0_8 = arith.constant 0 : index
      %12 = vector.load %arg5[%c0_7, %c0_8] : memref<32x128xf32, #tpu.memory_space<vmem>>, vector<32x128xf32>
      tpu.vector_store %arg5[%c0_7, %c0_8], %11 {strides = array<i32>} : memref<32x128xf32, #tpu.memory_space<vmem>>, vector<32x128xf32>,
    } else {
    }
    %c0_i32_1 = arith.constant 0 : i32
    %3 = arith.cmpi eq, %arg0, %c0_i32_1 : i32
    %4 = arith.extui %3 : i1 to i32
    %c0_i32_2 = arith.constant 0 : i32
    %5 = arith.cmpi ne, %4, %c0_i32_2 : i32
    scf.if %5 {
      %c0 = arith.constant 0 : index
      %c0_5 = arith.constant 0 : index
      %9 = vector.load %arg1[%c0, %c0_5] : memref<32x128xf32, #tpu.memory_space<vmem>>, vector<32x128xf32>
      %c0_6 = arith.constant 0 : index
      %c0_7 = arith.constant 0 : index
      %10 = vector.load %arg2[%c0_6, %c0_7] : memref<32x128xf32, #tpu.memory_space<vmem>>, vector<32x128xf32>
      %11 = arith.subf %9, %10 : vector<32x128xf32>
      %12 = arith.mulf %11, %11 : vector<32x128xf32>
      %13 = tpu.iota {dimensions = array<i32: 0>} : vector<32x128xi32>
      %c0_i32_8 = arith.constant 0 : i32
      %14 = vector.broadcast %c0_i32_8 : i32 to vector<32x128xi32>
      %15 = arith.addi %13, %14 : vector<32x128xi32>
      %c16_i32 = arith.constant 16 : i32
      %16 = vector.broadcast %c16_i32 : i32 to vector<32x128xi32>
      %17 = arith.cmpi slt, %15, %16 : vector<32x128xi32>
      %cst = arith.constant 0.000000e+00 : f32
      %18 = vector.broadcast %cst : f32 to vector<32x128xf32>
      %19 = arith.select %17, %12, %18 : vector<32x128xi1>, vector<32x128xf32>
      %c0_9 = arith.constant 0 : index
      %c0_10 = arith.constant 0 : index
      %20 = vector.load %arg4[%c0_9, %c0_10] : memref<32x128xf32, #tpu.memory_space<vmem>>, vector<32x128xf32>
      %21 = vector.shape_cast %19 : vector<32x128xf32> to vector<1x32x128xf32>
      %cst_11 = arith.constant dense<0.000000e+00> : vector<32x128xf32>
      %22 = vector.multi_reduction <add>, %21, %cst_11 [0] : vector<1x32x128xf32> to vector<32x128xf32>
      %23 = arith.addf %20, %22 : vector<32x128xf32>
      %c0_12 = arith.constant 0 : index
      %c0_13 = arith.constant 0 : index
      %24 = vector.load %arg4[%c0_12, %c0_13] : memref<32x128xf32, #tpu.memory_space<vmem>>, vector<32x128xf32>
      tpu.vector_store %arg4[%c0_12, %c0_13], %23 {strides = array<i32>} : memref<32x128xf32, #tpu.memory_space<vmem>>, vector<32x128xf32>,
    } else {
    }
    %c0_i32_3 = arith.constant 0 : i32
    %6 = arith.cmpi eq, %arg0, %c0_i32_3 : i32
    %7 = arith.extui %6 : i1 to i32
    %c0_i32_4 = arith.constant 0 : i32
    %8 = arith.cmpi ne, %7, %c0_i32_4 : i32
    scf.if %8 {
      %c0 = arith.constant 0 : index
      %c0_5 = arith.constant 0 : index
      %9 = vector.load %arg3[%c0, %c0_5] : memref<32x128xf32, #tpu.memory_space<vmem>>, vector<32x128xf32>
      %10 = tpu.iota {dimensions = array<i32: 0>} : vector<32x128xi32>
      %c0_i32_6 = arith.constant 0 : i32
      %11 = vector.broadcast %c0_i32_6 : i32 to vector<32x128xi32>
      %12 = arith.addi %10, %11 : vector<32x128xi32>
      %c16_i32 = arith.constant 16 : i32
      %13 = vector.broadcast %c16_i32 : i32 to vector<32x128xi32>
      %14 = arith.cmpi slt, %12, %13 : vector<32x128xi32>
      %cst = arith.constant 0.000000e+00 : f32
      %15 = vector.broadcast %cst : f32 to vector<32x128xf32>
      %16 = arith.select %14, %9, %15 : vector<32x128xi1>, vector<32x128xf32>
      %c0_7 = arith.constant 0 : index
      %c0_8 = arith.constant 0 : index
      %17 = vector.load %arg5[%c0_7, %c0_8] : memref<32x128xf32, #tpu.memory_space<vmem>>, vector<32x128xf32>
      %18 = vector.shape_cast %16 : vector<32x128xf32> to vector<1x32x128xf32>
      %cst_9 = arith.constant dense<0.000000e+00> : vector<32x128xf32>
      %19 = vector.multi_reduction <add>, %18, %cst_9 [0] : vector<1x32x128xf32> to vector<32x128xf32>
      %20 = arith.addf %17, %19 : vector<32x128xf32>
      %c0_10 = arith.constant 0 : index
      %c0_11 = arith.constant 0 : index
      %21 = vector.load %arg5[%c0_10, %c0_11] : memref<32x128xf32, #tpu.memory_space<vmem>>, vector<32x128xf32>
      tpu.vector_store %arg5[%c0_10, %c0_11], %20 {strides = array<i32>} : memref<32x128xf32, #tpu.memory_space<vmem>>, vector<32x128xf32>,
    } else {
    }
    return
  }
  func.func @transform_0(%arg0: i32) -> (i32, i32) {
    %c0_i32 = arith.constant 0 : i32
    %c0_i32_0 = arith.constant 0 : i32
    return %arg0, %c0_i32 : i32, i32
  }
  func.func @transform_1(%arg0: i32) -> (i32, i32) {
    %c0_i32 = arith.constant 0 : i32
    %c0_i32_0 = arith.constant 0 : i32
    return %arg0, %c0_i32 : i32, i32
  }
  func.func @transform_2(%arg0: i32) -> (i32, i32) {
    %c0_i32 = arith.constant 0 : i32
    %c0_i32_0 = arith.constant 0 : i32
    return %arg0, %c0_i32 : i32, i32
  }
  func.func @transform_3(%arg0: i32) -> (i32, i32) {
    %c0_i32 = arith.constant 0 : i32
    %c0_i32_0 = arith.constant 0 : i32
    %c0_i32_1 = arith.constant 0 : i32
    return %c0_i32, %c0_i32_0 : i32, i32
  }
  func.func @transform_4(%arg0: i32) -> (i32, i32) {
    %c0_i32 = arith.constant 0 : i32
    %c0_i32_0 = arith.constant 0 : i32
    %c0_i32_1 = arith.constant 0 : i32
    return %c0_i32, %c0_i32_0 : i32, i32
  }
}

</mosaic_0001>

<bundles_post_ra>
// kernel: generator_loss.1
= control target key start
LH: loop header
LB: loop body
LE: loop exit
PB: predicated region body
PF: predicated region fallthrough
CT: control target
= control target key end

     0   :  { %v106_v3 = vmov 0.0   ;;  %s174_s3 = inlined_call_operand.vmem [shape: f32[32,128], index: 3, kind: output, shape index: {0}]   ;;  %s175_s4 = inlined_call_operand.vmem [shape: f32[32,128], index: 4, kind: output, shape index: {1}]   ;;  %s176_s0 = inlined_call_operand.vmem [shape: f32[16,128], index: 0, kind: input, shape index: {}]   ;;  %s177_s1 = inlined_call_operand.vmem [shape: f32[16,128], index: 1, kind: input, shape index: {}]   ;;  %s178_s2 = inlined_call_operand.vmem [shape: f32[16,128], index: 2, kind: input, shape index: {}]  }
   0x1   :  { %v28_v0 = vld [vmem:[%s176_s0] sm:$0xff]  ;;  %v29_v2 = vld [vmem:[%s176_s0 + $0x8] sm:$0xff]  ;;  %71 = vst [vmem:[%s174_s3 + $0x10] sm:$0xff] %v106_v3  ;;  %72 = vst [vmem:[%s174_s3 + $0x18] sm:$0xff] %v106_v3 }
   0x2   :  { %v32_v1 = vld [vmem:[%s177_s1] sm:$0xff]  ;;  %95 = vst [vmem:[%s175_s4 + $0x10] sm:$0xff] %v106_v3  ;;  %96 = vst [vmem:[%s175_s4 + $0x18] sm:$0xff] %v106_v3  ;;  %v33_v5 = vld [vmem:[%s177_s1 + $0x8] sm:$0xff] }
   0x3   :  { %v36_v4 = vsub.f32 %v28_v0, %v32_v1  ;;  %v73_v6 = vld [vmem:[%s178_s2] sm:$0xff]  ;;  %v74_v7 = vld [vmem:[%s178_s2 + $0x8] sm:$0xff]  ;;  %v37_v8 = vsub.f32 %v29_v2, %v33_v5 }
   0x4   :  { %93 = vst [vmem:[%s175_s4] sm:$0xff] %v73_v6  ;;  %94 = vst [vmem:[%s175_s4 + $0x8] sm:$0xff] %v74_v7 }
   0x5   :  { %v40_v9 = vmul.f32 %v36_v4, %v36_v4  ;;  %v41_v10 = vmul.f32 %v37_v8, %v37_v8 }
   0x7   :  { %69 = vst [vmem:[%s174_s3] sm:$0xff] %v40_v9  ;;  %70 = vst [vmem:[%s174_s3 + $0x8] sm:$0xff] %v41_v10 }

</bundles_post_ra>
